<compile_context>
chip_gen: v7x
topology: tpu7x:2x2x1
jax: 0.10.0
libtpu: 0.0.40
codegen_flags: <defaults>
</compile_context>

<pallas_src>
import functools

import jax
import jax.numpy as jnp
from jax.experimental import pallas as pl
from jax.experimental.pallas import tpu as pltpu

_D_IN = 64
_D_OUT_PAD = 8   # narrow lane padding of the final projection / kernel output
_MIN_TILE = 512  # never shrink batch tiles below this when splitting for v7x


def _round_up(x, m):
    return ((x + m - 1) // m) * m


def _cdiv(a, b):
    return (a + b - 1) // b


def _gelu_exact(x):
    # PyTorch nn.GELU() default: exact erf-based formulation.
    return 0.5 * x * (1.0 + jax.lax.erf(x * 0.7071067811865476))


def _gelu_tanh(x):
    # tanh approximation: transcendental goes to the (otherwise idle) EUP slot
    # instead of a long erf polynomial on the VALU.  Opt-in only.
    return jax.nn.gelu(x, approximate=True)


def _tensorcores_per_chip():
    """Best-effort TC-per-chip count (v7x=2, v5e/v6e=1); never raises."""
    try:
        info = pltpu.get_tpu_info()
    except Exception:
        return 1
    for attr in ("num_tensorcores", "tensorcore_count", "num_cores",
                 "cores_per_chip"):
        v = getattr(info, attr, None)
        if isinstance(v, int) and v > 0:
            return v
    name = (str(getattr(info, "chip_version", "")) +
            str(getattr(info, "name", ""))).lower()
    if "7" in name:
        return 2
    return 1


def encoder_kernel(x_ref,
                   w1_ref, b1_ref,
                   w2_ref, b2_ref,
                   w3_ref, b3_ref,
                   w4_ref, b4_ref,
                   o_ref, *, gelu_fn):
    cdt = w1_ref.dtype  # MXU input dtype (bf16 default / f32 exact path)
    h = x_ref[...].astype(cdt)
    for w_ref, b_ref in ((w1_ref, b1_ref), (w2_ref, b2_ref), (w3_ref, b3_ref)):
        z = jnp.dot(h, w_ref[...],
                    preferred_element_type=jnp.float32) + b_ref[...]
        # GELU in f32 (accumulator dtype); the cast feeds the next matmul.
        h = gelu_fn(z).astype(cdt)
    out = jnp.dot(h, w4_ref[...],
                  preferred_element_type=jnp.float32) + b4_ref[...]
    o_ref[...] = out.astype(o_ref.dtype)


def prepare_encoder_params(params, compute_dtype=jnp.bfloat16):
    """One-time parameter prep: bf16 cast + 2->8 padding of the final layer."""
    (w1, b1), (w2, b2), (w3, b3), (w4, b4) = params
    d_out = w4.shape[1]  # 2
    w4p = jnp.zeros((w4.shape[0], _D_OUT_PAD), w4.dtype).at[:, :d_out].set(w4)
    b4p = jnp.zeros((1, _D_OUT_PAD), b4.dtype).at[:, :d_out].set(b4)
    ws = tuple(w.astype(compute_dtype) for w in (w1, w2, w3, w4p))
    bs = tuple(b.astype(jnp.float32) for b in (b1, b2, b3, b4p))
    return ws, bs, d_out


def encoder_forward(x, prepared_params, *, block_b=2048, gelu_approx=False):
    """x: [B, 64] float32 -> [B, 2] float32 (fused 4-layer MLP)."""
    ws, bs, d_out = prepared_params
    B, d_in = x.shape
    assert d_in == _D_IN

    # ---- batch tiling ----------------------------------------------------
    # Biggest sublane-aligned tile, capped at the (rounded-up) batch so we
    # never compute more than 7 padded rows of waste.
    max_bb = max(8, min(_round_up(block_b, 8), _round_up(B, 8)))
    n_steps = _cdiv(_round_up(B, 8), max_bb)
    # Split across grid steps only on multi-TC chips (v7x); even & balanced,
    # never below _MIN_TILE rows.  On single-TC v5e/v6e a split is pure
    # per-step overhead (the grid is a serial loop).
    if _tensorcores_per_chip() >= 2 and B >= 2 * _MIN_TILE:
        n_steps = _round_up(max(n_steps, 2), 2)
    bb = max(8, _round_up(_cdiv(B, n_steps), 8))
    B_pad = _round_up(B, bb)
    if B_pad != B:
        x = jnp.pad(x, ((0, B_pad - B), (0, 0)))
    grid = (B_pad // bb,)

    # ---- specs -----------------------------------------------------------
    def rep(arr):  # tiny weight/bias, same block for every grid step
        return pl.BlockSpec(arr.shape, lambda i: (0, 0))

    in_specs = [pl.BlockSpec((bb, _D_IN), lambda i: (i, 0))]
    operands = [x]
    for w, b in zip(ws, bs):
        in_specs += [rep(w), rep(b)]
        operands += [w, b]
    out_spec = pl.BlockSpec((bb, _D_OUT_PAD), lambda i: (i, 0))

    cost = pl.CostEstimate(
        flops=2 * B_pad * (3 * _D_IN * _D_IN + _D_IN * _D_OUT_PAD),
        transcendentals=3 * B_pad * _D_IN,
        bytes_accessed=(int(x.size) * x.dtype.itemsize
                        + B_pad * _D_OUT_PAD * 4
                        + sum(int(w.size) * w.dtype.itemsize for w in ws)
                        + sum(int(b.size) * b.dtype.itemsize for b in bs)),
    )

    kernel = functools.partial(
        encoder_kernel, gelu_fn=_gelu_tanh if gelu_approx else _gelu_exact)

    out = pl.pallas_call(
        kernel,
        out_shape=jax.ShapeDtypeStruct((B_pad, _D_OUT_PAD), jnp.float32),
        grid_spec=pltpu.PrefetchScalarGridSpec(
            num_scalar_prefetch=0,
            grid=grid,
            in_specs=in_specs,
            out_specs=out_spec,
        ),
        compiler_params=pltpu.CompilerParams(
            dimension_semantics=("parallel",)),
        cost_estimate=cost,
    )(*operands)

    return out[:B, :d_out]


def init_encoder_params(key):
    """Deterministic init mimicking torch nn.Linear default U(-1/sqrt(fan_in), +)."""
    dims = [(64, 64), (64, 64), (64, 64), (64, 2)]
    params = []
    for (fan_in, fan_out) in dims:
        key, kw, kb = jax.random.split(key, 3)
        bound = 1.0 / jnp.sqrt(jnp.float32(fan_in))
        # Stored as [in, out] so the kernel computes x @ W + b.
        w = jax.random.uniform(kw, (fan_in, fan_out), jnp.float32, -bound, bound)
        b = jax.random.uniform(kb, (1, fan_out), jnp.float32, -bound, bound)
        params.append((w, b))
    return params


def encoder_reference(x, params):
    h = x
    for li, (w, b) in enumerate(params):
        h = h @ w + b
        if li < len(params) - 1:
            h = _gelu_exact(h)
    return h


if __name__ == "__main__":
    key = jax.random.PRNGKey(0)
    kx, kx2, kp = jax.random.split(key, 3)

    B = 8
    x = jax.random.normal(kx, (B, _D_IN), jnp.float32)
    params = init_encoder_params(kp)
    ref = encoder_reference(x, params)

    # Exact path (f32 MXU inputs): tight tolerance vs f32 reference.
    prep_f32 = prepare_encoder_params(params, compute_dtype=jnp.float32)
    out_f32 = jax.block_until_ready(encoder_forward(x, prep_f32))
    assert out_f32.shape == (B, 2)
    err = float(jnp.max(jnp.abs(out_f32 - ref)))
    assert err < 1e-4, f"f32 path max abs err {err}"

    # Default fast path (bf16 MXU inputs, f32 accumulation): loose tolerance.
    prep_bf16 = prepare_encoder_params(params)  # prepared once, reused per call
    out_bf16 = jax.block_until_ready(encoder_forward(x, prep_bf16))
    assert out_bf16.shape == (B, 2)
    err = float(jnp.max(jnp.abs(out_bf16 - ref)))
    assert err < 5e-2, f"bf16 path max abs err {err}"

    # Non-multiple-of-8 batch exercises the pad-and-slice path.
    B2 = 37
    x2 = jax.random.normal(kx2, (B2, _D_IN), jnp.float32)
    ref2 = encoder_reference(x2, params)
    out2 = jax.block_until_ready(encoder_forward(x2, prep_bf16))
    assert out2.shape == (B2, 2)
    err2 = float(jnp.max(jnp.abs(out2 - ref2)))
    assert err2 < 5e-2, f"bf16 padded-batch path max abs err {err2}"

    print("KERNEL_OK")
</pallas_src>

<mosaic_0001>
module attributes {stable_mosaic.version = 11 : i64} {
  func.func @encoder_kernel(%arg0: i32, %arg1: memref<8x64xf32, #tpu.memory_space<vmem>>, %arg2: memref<64x64xf32, #tpu.memory_space<vmem>>, %arg3: memref<1x64xf32, #tpu.memory_space<vmem>>, %arg4: memref<64x64xf32, #tpu.memory_space<vmem>>, %arg5: memref<1x64xf32, #tpu.memory_space<vmem>>, %arg6: memref<64x64xf32, #tpu.memory_space<vmem>>, %arg7: memref<1x64xf32, #tpu.memory_space<vmem>>, %arg8: memref<64x8xf32, #tpu.memory_space<vmem>>, %arg9: memref<1x8xf32, #tpu.memory_space<vmem>>, %arg10: memref<8x8xf32, #tpu.memory_space<vmem>>) attributes {dimension_semantics = [#tpu.dimension_semantics<parallel>], iteration_bounds = array<i64: 1>, scalar_prefetch = 0 : i64, scratch_operands = 0 : i64, tpu.core_type = #tpu.core_type<tc>, window_params = [{transform_indices = @transform_0, window_bounds = array<i64: 8, 64>}, {pipeline_mode = #tpu.pipeline_mode<synchronous>, transform_indices = @transform_1, window_bounds = array<i64: 64, 64>}, {pipeline_mode = #tpu.pipeline_mode<synchronous>, transform_indices = @transform_2, window_bounds = array<i64: 1, 64>}, {pipeline_mode = #tpu.pipeline_mode<synchronous>, transform_indices = @transform_3, window_bounds = array<i64: 64, 64>}, {pipeline_mode = #tpu.pipeline_mode<synchronous>, transform_indices = @transform_4, window_bounds = array<i64: 1, 64>}, {pipeline_mode = #tpu.pipeline_mode<synchronous>, transform_indices = @transform_5, window_bounds = array<i64: 64, 64>}, {pipeline_mode = #tpu.pipeline_mode<synchronous>, transform_indices = @transform_6, window_bounds = array<i64: 1, 64>}, {pipeline_mode = #tpu.pipeline_mode<synchronous>, transform_indices = @transform_7, window_bounds = array<i64: 64, 8>}, {pipeline_mode = #tpu.pipeline_mode<synchronous>, transform_indices = @transform_8, window_bounds = array<i64: 1, 8>}, {transform_indices = @transform_9, window_bounds = array<i64: 8, 8>}]} {
    %c0 = arith.constant 0 : index
    %c0_0 = arith.constant 0 : index
    %0 = vector.load %arg1[%c0, %c0_0] : memref<8x64xf32, #tpu.memory_space<vmem>>, vector<8x64xf32>
    %c0_1 = arith.constant 0 : index
    %c0_2 = arith.constant 0 : index
    %1 = vector.load %arg2[%c0_1, %c0_2] : memref<64x64xf32, #tpu.memory_space<vmem>>, vector<64x64xf32>
    %cst = arith.constant dense<0.000000e+00> : vector<8x64xf32>
    %2 = tpu.matmul %0, %1, %cst {dimension_numbers = #tpu.dot_dimension_numbers<[1], [0], [0], [1], [0, 0, 1, 1], [], []>} : vector<8x64xf32>, vector<64x64xf32>, vector<8x64xf32> -> vector<8x64xf32>
    %c0_3 = arith.constant 0 : index
    %c0_4 = arith.constant 0 : index
    %3 = vector.load %arg3[%c0_3, %c0_4] : memref<1x64xf32, #tpu.memory_space<vmem>>, vector<1x64xf32>
    %4 = vector.broadcast %3 : vector<1x64xf32> to vector<8x64xf32>
    %5 = arith.addf %2, %4 : vector<8x64xf32>
    %cst_5 = arith.constant 5.000000e-01 : f32
    %6 = vector.broadcast %cst_5 : f32 to vector<8x64xf32>
    %7 = arith.mulf %6, %5 : vector<8x64xf32>
    %cst_6 = arith.constant 0.707106769 : f32
    %8 = vector.broadcast %cst_6 : f32 to vector<8x64xf32>
    %9 = arith.mulf %5, %8 : vector<8x64xf32>
    %10 = math.erf %9 : vector<8x64xf32>
    %cst_7 = arith.constant 1.000000e+00 : f32
    %11 = vector.broadcast %cst_7 : f32 to vector<8x64xf32>
    %12 = arith.addf %11, %10 : vector<8x64xf32>
    %13 = arith.mulf %7, %12 : vector<8x64xf32>
    %c0_8 = arith.constant 0 : index
    %c0_9 = arith.constant 0 : index
    %14 = vector.load %arg4[%c0_8, %c0_9] : memref<64x64xf32, #tpu.memory_space<vmem>>, vector<64x64xf32>
    %cst_10 = arith.constant dense<0.000000e+00> : vector<8x64xf32>
    %15 = tpu.matmul %13, %14, %cst_10 {dimension_numbers = #tpu.dot_dimension_numbers<[1], [0], [0], [1], [0, 0, 1, 1], [], []>} : vector<8x64xf32>, vector<64x64xf32>, vector<8x64xf32> -> vector<8x64xf32>
    %c0_11 = arith.constant 0 : index
    %c0_12 = arith.constant 0 : index
    %16 = vector.load %arg5[%c0_11, %c0_12] : memref<1x64xf32, #tpu.memory_space<vmem>>, vector<1x64xf32>
    %17 = vector.broadcast %16 : vector<1x64xf32> to vector<8x64xf32>
    %18 = arith.addf %15, %17 : vector<8x64xf32>
    %cst_13 = arith.constant 5.000000e-01 : f32
    %19 = vector.broadcast %cst_13 : f32 to vector<8x64xf32>
    %20 = arith.mulf %19, %18 : vector<8x64xf32>
    %cst_14 = arith.constant 0.707106769 : f32
    %21 = vector.broadcast %cst_14 : f32 to vector<8x64xf32>
    %22 = arith.mulf %18, %21 : vector<8x64xf32>
    %23 = math.erf %22 : vector<8x64xf32>
    %cst_15 = arith.constant 1.000000e+00 : f32
    %24 = vector.broadcast %cst_15 : f32 to vector<8x64xf32>
    %25 = arith.addf %24, %23 : vector<8x64xf32>
    %26 = arith.mulf %20, %25 : vector<8x64xf32>
    %c0_16 = arith.constant 0 : index
    %c0_17 = arith.constant 0 : index
    %27 = vector.load %arg6[%c0_16, %c0_17] : memref<64x64xf32, #tpu.memory_space<vmem>>, vector<64x64xf32>
    %cst_18 = arith.constant dense<0.000000e+00> : vector<8x64xf32>
    %28 = tpu.matmul %26, %27, %cst_18 {dimension_numbers = #tpu.dot_dimension_numbers<[1], [0], [0], [1], [0, 0, 1, 1], [], []>} : vector<8x64xf32>, vector<64x64xf32>, vector<8x64xf32> -> vector<8x64xf32>
    %c0_19 = arith.constant 0 : index
    %c0_20 = arith.constant 0 : index
    %29 = vector.load %arg7[%c0_19, %c0_20] : memref<1x64xf32, #tpu.memory_space<vmem>>, vector<1x64xf32>
    %30 = vector.broadcast %29 : vector<1x64xf32> to vector<8x64xf32>
    %31 = arith.addf %28, %30 : vector<8x64xf32>
    %cst_21 = arith.constant 5.000000e-01 : f32
    %32 = vector.broadcast %cst_21 : f32 to vector<8x64xf32>
    %33 = arith.mulf %32, %31 : vector<8x64xf32>
    %cst_22 = arith.constant 0.707106769 : f32
    %34 = vector.broadcast %cst_22 : f32 to vector<8x64xf32>
    %35 = arith.mulf %31, %34 : vector<8x64xf32>
    %36 = math.erf %35 : vector<8x64xf32>
    %cst_23 = arith.constant 1.000000e+00 : f32
    %37 = vector.broadcast %cst_23 : f32 to vector<8x64xf32>
    %38 = arith.addf %37, %36 : vector<8x64xf32>
    %39 = arith.mulf %33, %38 : vector<8x64xf32>
    %c0_24 = arith.constant 0 : index
    %c0_25 = arith.constant 0 : index
    %40 = vector.load %arg8[%c0_24, %c0_25] : memref<64x8xf32, #tpu.memory_space<vmem>>, vector<64x8xf32>
    %cst_26 = arith.constant dense<0.000000e+00> : vector<8x8xf32>
    %41 = tpu.matmul %39, %40, %cst_26 {dimension_numbers = #tpu.dot_dimension_numbers<[1], [0], [0], [1], [0, 0, 1, 1], [], []>} : vector<8x64xf32>, vector<64x8xf32>, vector<8x8xf32> -> vector<8x8xf32>
    %c0_27 = arith.constant 0 : index
    %c0_28 = arith.constant 0 : index
    %42 = vector.load %arg9[%c0_27, %c0_28] : memref<1x8xf32, #tpu.memory_space<vmem>>, vector<1x8xf32>
    %43 = vector.broadcast %42 : vector<1x8xf32> to vector<8x8xf32>
    %44 = arith.addf %41, %43 : vector<8x8xf32>
    %c0_29 = arith.constant 0 : index
    %c0_30 = arith.constant 0 : index
    %45 = vector.load %arg10[%c0_29, %c0_30] : memref<8x8xf32, #tpu.memory_space<vmem>>, vector<8x8xf32>
    tpu.vector_store %arg10[%c0_29, %c0_30], %44 {strides = array<i32>} : memref<8x8xf32, #tpu.memory_space<vmem>>, vector<8x8xf32>,
    return
  }
  func.func @transform_0(%arg0: i32) -> (i32, i32) {
    %c0_i32 = arith.constant 0 : i32
    %c0_i32_0 = arith.constant 0 : i32
    return %arg0, %c0_i32 : i32, i32
  }
  func.func @transform_1(%arg0: i32) -> (i32, i32) {
    %c0_i32 = arith.constant 0 : i32
    %c0_i32_0 = arith.constant 0 : i32
    %c0_i32_1 = arith.constant 0 : i32
    return %c0_i32, %c0_i32_0 : i32, i32
  }
  func.func @transform_2(%arg0: i32) -> (i32, i32) {
    %c0_i32 = arith.constant 0 : i32
    %c0_i32_0 = arith.constant 0 : i32
    %c0_i32_1 = arith.constant 0 : i32
    return %c0_i32, %c0_i32_0 : i32, i32
  }
  func.func @transform_3(%arg0: i32) -> (i32, i32) {
    %c0_i32 = arith.constant 0 : i32
    %c0_i32_0 = arith.constant 0 : i32
    %c0_i32_1 = arith.constant 0 : i32
    return %c0_i32, %c0_i32_0 : i32, i32
  }
  func.func @transform_4(%arg0: i32) -> (i32, i32) {
    %c0_i32 = arith.constant 0 : i32
    %c0_i32_0 = arith.constant 0 : i32
    %c0_i32_1 = arith.constant 0 : i32
    return %c0_i32, %c0_i32_0 : i32, i32
  }
  func.func @transform_5(%arg0: i32) -> (i32, i32) {
    %c0_i32 = arith.constant 0 : i32
    %c0_i32_0 = arith.constant 0 : i32
    %c0_i32_1 = arith.constant 0 : i32
    return %c0_i32, %c0_i32_0 : i32, i32
  }
  func.func @transform_6(%arg0: i32) -> (i32, i32) {
    %c0_i32 = arith.constant 0 : i32
    %c0_i32_0 = arith.constant 0 : i32
    %c0_i32_1 = arith.constant 0 : i32
    return %c0_i32, %c0_i32_0 : i32, i32
  }
  func.func @transform_7(%arg0: i32) -> (i32, i32) {
    %c0_i32 = arith.constant 0 : i32
    %c0_i32_0 = arith.constant 0 : i32
    %c0_i32_1 = arith.constant 0 : i32
    return %c0_i32, %c0_i32_0 : i32, i32
  }
  func.func @transform_8(%arg0: i32) -> (i32, i32) {
    %c0_i32 = arith.constant 0 : i32
    %c0_i32_0 = arith.constant 0 : i32
    %c0_i32_1 = arith.constant 0 : i32
    return %c0_i32, %c0_i32_0 : i32, i32
  }
  func.func @transform_9(%arg0: i32) -> (i32, i32) {
    %c0_i32 = arith.constant 0 : i32
    %c0_i32_0 = arith.constant 0 : i32
    return %arg0, %c0_i32 : i32, i32
  }
}

</mosaic_0001>

<bundles_post_ra>
// kernel: tpu_custom_call.1
= control target key start
LH: loop header
LB: loop body
LE: loop exit
PB: predicated region body
PF: predicated region fallthrough
CT: control target
= control target key end

     0   :  { %14 = vsyncpa [#allocation3], 0  ;;  %s883_s0 = inlined_call_operand.vmem [shape: f32[8,64], index: 0, kind: input, shape index: {}]   ;;  %s884_s1 = inlined_call_operand.vmem [shape: f32[64,64], index: 1, kind: input, shape index: {}]   ;;  %s885_s2 = inlined_call_operand.vmem [shape: f32[1,64], index: 2, kind: input, shape index: {}]   ;;  %s886_s3 = inlined_call_operand.hbm [shape: f32[64,64], index: 3, kind: input, shape index: {}]   ;;  %s887_s4 = inlined_call_operand.vmem [shape: f32[1,64], index: 4, kind: input, shape index: {}]   ;;  %s888_s5 = inlined_call_operand.hbm [shape: f32[64,64], index: 5, kind: input, shape index: {}]   ;;  %s889_s6 = inlined_call_operand.vmem [shape: f32[1,64], index: 6, kind: input, shape index: {}]   ;;  %s890_s7 = inlined_call_operand.vmem [shape: f32[64,8], index: 7, kind: input, shape index: {}]   ;;  %s891_s8 = inlined_call_operand.vmem [shape: f32[1,8], index: 8, kind: input, shape index: {}]   ;;  %s892_s9 = inlined_call_operand.hbm [shape: f32[8,8], index: 9, kind: output, shape index: {}]  }
   0x1   :  { %15 = vsyncpa [#allocation6], 0 }
   0x2   :  { %16 = vsyncpa [#allocation4], 0  ;;  %s702_s30 = smov [#allocation2]   ;;  %s630_s13 = scalar_lea.hbm %s886_s3, 1024 }
   0x3   :  { %s28_s10 = sshll.u32 %s702_s30, 4  ;;  %p631_p0 = scmp.ne.s32.totalorder %s886_s3, %s630_s13  ;;  %s29_s10 = int_to_ptr.vmem [resolvable:$true] %s28_s10 }
   0x4   :  { %p634_p1 = scmp.lt.u32.totalorder %s630_s13, %s886_s3 }
   0x6   :  { %p636_p2 = pnand %p634_p1, %p631_p0 }
   0x8   :  { %639 = shalt.err (!%p636_p2)
}
   0x9   :  { %s640_s18 = scalar_lea.vmem %s29_s10, 1024  ;;  %p645_p4 = scmp.lt.s32.totalorder %s29_s10, %s29_s10 }
   0xa   :  { %p641_p3 = scmp.ne.s32.totalorder %s29_s10, %s640_s18  ;;  %p646_p5 = scmp.lt.s32.totalorder %s640_s18, %s640_s18 }
   0xc   :  { %p647_p6 = por %p646_p5, %p645_p4 }
   0xe   :  { %p648_p7 = pnand %p647_p6, %p641_p3 }
  0x10   :  { %651 = shalt.err (!%p648_p7)
}
  0x11   :  { %s703_s19 = smov 128   ;;  %s704_s20 = smov 8  }
  0x12   :  { %34 = dma.hbm_to_vmem [thread:$0]  %s886_s3, 1024, %s29_s10, [#allocation3], %s703_s19, %s703_s19, %s704_s20  }
  0x13   :  { %s705_s23 = smov [#allocation5]   ;;  %s652_s27 = scalar_lea.hbm %s888_s5, 1024 }
  0x14   :  { %s42_s24 = sshll.u32 %s705_s23, 4  ;;  %p653_p8 = scmp.ne.s32.totalorder %s888_s5, %s652_s27  ;;  %s43_s24 = int_to_ptr.vmem [resolvable:$true] %s42_s24 }
  0x15   :  { %p656_p9 = scmp.lt.u32.totalorder %s652_s27, %s888_s5 }
  0x17   :  { %p658_p10 = pnand %p656_p9, %p653_p8 }
  0x19   :  { %661 = shalt.err (!%p658_p10)
}
  0x1a   :  { %s662_s12 = scalar_lea.vmem %s43_s24, 1024  ;;  %p667_p12 = scmp.lt.s32.totalorder %s43_s24, %s43_s24 }
  0x1b   :  { %p663_p11 = scmp.ne.s32.totalorder %s43_s24, %s662_s12  ;;  %p668_p13 = scmp.lt.s32.totalorder %s662_s12, %s662_s12 }
  0x1d   :  { %p669_p0 = por %p668_p13, %p667_p12 }
  0x1f   :  { %p670_p1 = pnand %p669_p0, %p663_p11 }
  0x21   :  { %673 = shalt.err (!%p670_p1)
}
  0x22   :  { %48 = dma.hbm_to_vmem [thread:$0]  %s888_s5, 1024, %s43_s24, [#allocation6], %s703_s19, %s703_s19, %s704_s20  }
  0x23   :  { %696 = dma.done.wait [#allocation3], 1024  }
  0x24   :  { %697 = vsyncadd [#allocation3], 4294966272 }
  0x25   :  { %698 = dma.done.wait [#allocation6], 1024  }
  0x26   :  { %699 = vsyncadd [#allocation6], 4294966272  ;;  %v706_v0 = vmov 0.0|0.0   ;;  %vm707_vm0 = vmmov 0   ;;  %v708_v1 = vmov 0.0   ;;  %v62_v2 = vld [vmem:[%s884_s1] sm:$0xff] }
  0x27   :  { %568 = vmatprep.subr.bf16.mxu0 %v706_v0  ;;  %508 = vmatprep.mubr.msk.f32.mxu0 %vm707_vm0, %v708_v1  ;;  %v63_v3 = vld [vmem:[%s884_s1 + $0x8] sm:$0xff]  ;;  %v64_v4 = vld [vmem:[%s884_s1 + $0x10] sm:$0xff]  ;;  %v65_v6 = vld [vmem:[%s884_s1 + $0x18] sm:$0xff]  ;;  %vm77_vm1 = vcmask 523264   ;;  %vm430_vm2 = vcmask 64512  }
  0x28   :  { %580 = vmatprep.subr.bf16.mxu1 %v706_v0  ;;  %527 = vmatprep.mubr.msk.f32.mxu1 %vm707_vm0, %v708_v1  ;;  %v569_v5 = vpack.c.bf16 %v63_v3, %v62_v2  ;;  %v572_v7 = vpack.c.bf16 %v65_v6, %v64_v4  ;;  %v66_v8 = vld [vmem:[%s884_s1 + $0x20] sm:$0xff]  ;;  %v67_v9 = vld [vmem:[%s884_s1 + $0x28] sm:$0xff]  ;;  %v68_v11 = vld [vmem:[%s884_s1 + $0x30] sm:$0xff] }
  0x29   :  { %v575_v10 = vpack.c.bf16 %v67_v9, %v66_v8  ;;  %v69_v12 = vld [vmem:[%s884_s1 + $0x38] sm:$0xff]  ;;  %v61_v14 = vld [vmem:[%s883_s0] sm:$0xff]  ;;  %v157_v16 = vld [vmem:[#allocation2 + $0x8] sm:$0xff] }
  0x2a   :  { %570 = vmatpush3.bf16.msra.mxu0 %v569_v5  ;;  %v578_v13 = vpack.c.bf16 %v69_v12, %v68_v11  ;;  %v156_v15 = vld [vmem:[#allocation2] sm:$0xff]  ;;  %v158_v18 = vld [vmem:[#allocation2 + $0x10] sm:$0xff]  ;;  %v159_v19 = vld [vmem:[#allocation2 + $0x18] sm:$0xff] }
  0x2b   :  { %571 = vmatprep.subr.bf16.mxu0 %v706_v0  ;;  %v581_v17 = vpack.c.bf16 %v157_v16, %v156_v15  ;;  %v584_v20 = vpack.c.bf16 %v159_v19, %v158_v18  ;;  %v160_v21 = vld [vmem:[#allocation2 + $0x20] sm:$0xff]  ;;  %v161_v22 = vld [vmem:[#allocation2 + $0x28] sm:$0xff]  ;;  %v162_v24 = vld [vmem:[#allocation2 + $0x30] sm:$0xff] }
  0x2c   :  { %v587_v23 = vpack.c.bf16 %v161_v22, %v160_v21  ;;  %v163_v25 = vld [vmem:[#allocation2 + $0x38] sm:$0xff]  ;;  %v448_v27 = vld [vmem:[%s885_s2] ss:$0 sm:$0xff]  ;;  %v250_v37 = vld [vmem:[#allocation5 + $0x8] sm:$0xff] }
  0x2d   :  { %582 = vmatpush3.bf16.msra.mxu1 %v581_v17  ;;  %v590_v26 = vpack.c.bf16 %v163_v25, %v162_v24  ;;  %v249_v36 = vld [vmem:[#allocation5] sm:$0xff]  ;;  %v251_v39 = vld [vmem:[#allocation5 + $0x10] sm:$0xff]  ;;  %v252_v40 = vld [vmem:[#allocation5 + $0x18] sm:$0xff] }
  0x2e   :  { %573 = vmatpush3.bf16.msra.mxu0 %v572_v7  ;;  %583 = vmatprep.subr.bf16.mxu1 %v706_v0  ;;  %v593_v38 = vpack.c.bf16 %v250_v37, %v249_v36  ;;  %v596_v41 = vpack.c.bf16 %v252_v40, %v251_v39  ;;  %v253_v42 = vld [vmem:[#allocation5 + $0x20] sm:$0xff]  ;;  %v254_v43 = vld [vmem:[#allocation5 + $0x28] sm:$0xff]  ;;  %v255_v45 = vld [vmem:[#allocation5 + $0x30] sm:$0xff] }
  0x2f   :  { %574 = vmatprep.subr.bf16.mxu0 %v706_v0  ;;  %v599_v44 = vpack.c.bf16 %v254_v43, %v253_v42  ;;  %v256_v46 = vld [vmem:[#allocation5 + $0x38] sm:$0xff]  ;;  %v450_v48 = vld [vmem:[%s887_s4] ss:$0 sm:$0xff]  ;;  %v343_v58 = vld [vmem:[%s890_s7 + $0x8] sm:$0xff] }
  0x30   :  { %v602_v47 = vpack.c.bf16 %v256_v46, %v255_v45  ;;  %v342_v57 = vld [vmem:[%s890_s7] sm:$0xff]  ;;  %v344_v60 = vld [vmem:[%s890_s7 + $0x10] sm:$0xff]  ;;  %v345_v61 = vld [vmem:[%s890_s7 + $0x18] sm:$0xff] }
  0x31   :  { %585 = vmatpush3.bf16.msra.mxu1 %v584_v20  ;;  %v605_v59 = vpack.c.bf16 %v343_v58, %v342_v57  ;;  %v608_v62 = vpack.c.bf16 %v345_v61, %v344_v60  ;;  %v346_v63 = vld [vmem:[%s890_s7 + $0x20] sm:$0xff]  ;;  %v348_v3 = vld [vmem:[%s890_s7 + $0x30] sm:$0xff]  ;;  %v349_v4 = vld [vmem:[%s890_s7 + $0x38] sm:$0xff] }
  0x32   :  { %576 = vmatpush3.bf16.msra.mxu0 %v575_v10  ;;  %586 = vmatprep.subr.bf16.mxu1 %v706_v0  ;;  %v614_v5 = vpack.c.bf16 %v349_v4, %v348_v3  ;;  %v452_v6 = vld [vmem:[%s889_s6] ss:$0 sm:$0xff] }
  0x33   :  { %577 = vmatprep.subr.bf16.mxu0 %v706_v0 }
  0x35   :  { %588 = vmatpush3.bf16.msra.mxu1 %v587_v23 }
  0x36   :  { %579 = vmatpush3.bf16.msra.mxu0 %v578_v13  ;;  %589 = vmatprep.subr.bf16.mxu1 %v706_v0 }
  0x37   :  { %592 = vmatprep.subr.bf16.mxu0 %v706_v0 }
  0x39   :  { %509 = vmatmul.mubr.msk.f32.vlgmr.msra.gmra.mrb[0].mxu0 %vm77_vm1, %v61_v14  ;;  %591 = vmatpush3.bf16.msra.mxu1 %v590_v26  ;;  %v454_v14 = vld [vmem:[%s891_s8] ss:$0 sm:$0xff] }
  0x3a   :  { %546 = vmatprep.mubr.msk.f32.mxu0 %vm707_vm0, %v708_v1  ;;  %604 = vmatprep.subr.bf16.mxu1 %v706_v0 }
  0x3b   :  { %594 = vmatpush3.bf16.msra.mxu0 %v593_v38 }
  0x3c   :  { %595 = vmatprep.subr.bf16.mxu0 %v706_v0 }
  0x3f   :  { %597 = vmatpush3.bf16.msra.mxu0 %v596_v41 }
  0x40   :  { %598 = vmatprep.subr.bf16.mxu0 %v706_v0 }
  0x43   :  { %600 = vmatpush3.bf16.msra.mxu0 %v599_v44 }
  0x44   :  { %601 = vmatprep.subr.bf16.mxu0 %v706_v0 }
  0x47   :  { %603 = vmatpush3.bf16.msra.mxu0 %v602_v47 }
 0x10c   :  { %v147_v28 = vpop.f32.mrb[0].mxu0 }
 0x10d   :  { %v148_v29 = vadd.f32 %v448_v27, %v147_v28  ;;  %v510_v30 = vpop.f32.mrb[1].mxu0 }
 0x10f   :  { %v152_v31 = vmul.f32 0.70710677, %v148_v29  ;;  %v151_v33 = vmul.f32 0.5, %v148_v29 }
 0x111   :  { %624 = verf.f32 %v152_v31 }
 0x11b   :  { %v625_v32 = vpop.eup %624 }
 0x11c   :  { %v154_v34 = vadd.f32 1.0, %v625_v32 }
 0x11e   :  { %v155_v35 = vmul.f32 %v154_v34, %v151_v33 }
 0x120   :  { %528 = vmatmul.mubr.msk.f32.vlgmr.msra.gmra.mrb[0].mxu1 %vm77_vm1, %v155_v35 }
 0x121   :  { %565 = vmatprep.mubr.msk.f32.mxu1 %vm707_vm0, %v708_v1  ;;  %606 = vmatpush3.bf16.msra.mxu1 %v605_v59  ;;  %v347_v1 = vld [vmem:[%s890_s7 + $0x28] sm:$0xff]  ;;  %s709_s7 = smov [#allocation7]  }
 0x122   :  { %607 = vmatprep.subr.bf16.mxu1 %v706_v0  ;;  %v611_v2 = vpack.c.bf16 %v347_v1, %v346_v63  ;;  %s438_s27 = sshll.u32 %s709_s7, 4  ;;  %s439_s27 = int_to_ptr.vmem [resolvable:$true] %s438_s27 }
 0x123   :  { %s674_s6 = scalar_lea.vmem %s439_s27, 128  ;;  %p679_p3 = scmp.lt.s32.totalorder %s439_s27, %s439_s27 }
 0x124   :  { %p675_p2 = scmp.ne.s32.totalorder %s439_s27, %s674_s6  ;;  %p680_p4 = scmp.lt.s32.totalorder %s674_s6, %s674_s6 }
 0x125   :  { %609 = vmatpush3.bf16.msra.mxu1 %v608_v62 }
 0x126   :  { %610 = vmatprep.subr.bf16.mxu1 %v706_v0  ;;  %p681_p5 = por %p680_p4, %p679_p3 }
 0x128   :  { %p682_p6 = pnand %p681_p5, %p675_p2 }
 0x129   :  { %612 = vmatpush3.bf16.msra.mxu1 %v611_v2 }
 0x12a   :  { %613 = vmatprep.subr.bf16.mxu1 %v706_v0 }
 0x12d   :  { %615 = vmatpush3.bf16.msra.mxu1 %v614_v5 }
 0x1f3   :  { %v240_v49 = vpop.f32.mrb[0].mxu1 }
 0x1f4   :  { %v241_v50 = vadd.f32 %v450_v48, %v240_v49  ;;  %v529_v51 = vpop.f32.mrb[1].mxu1 }
 0x1f6   :  { %v245_v52 = vmul.f32 0.70710677, %v241_v50  ;;  %v244_v54 = vmul.f32 0.5, %v241_v50 }
 0x1f8   :  { %626 = verf.f32 %v245_v52 }
 0x202   :  { %v627_v53 = vpop.eup %626 }
 0x203   :  { %v247_v55 = vadd.f32 1.0, %v627_v53 }
 0x205   :  { %v248_v56 = vmul.f32 %v247_v55, %v244_v54 }
 0x207   :  { %547 = vmatmul.mubr.msk.f32.vlgmr.msra.gmra.mrb[2].mxu0 %vm77_vm1, %v248_v56 }
 0x2da   :  { %v333_v7 = vpop.f32.mrb[2].mxu0 }
 0x2db   :  { %v334_v8 = vadd.f32 %v452_v6, %v333_v7  ;;  %v548_v9 = vpop.f32.mrb[3].mxu0 }
 0x2dd   :  { %v338_v10 = vmul.f32 0.70710677, %v334_v8  ;;  %v337_v11 = vmul.f32 0.5, %v334_v8 }
 0x2df   :  { %628 = verf.f32 %v338_v10 }
 0x2e9   :  { %v629_v0 = vpop.eup %628 }
 0x2ea   :  { %v340_v12 = vadd.f32 1.0, %v629_v0 }
 0x2ec   :  { %v341_v13 = vmul.f32 %v340_v12, %v337_v11 }
 0x2ee   :  { %566 = vmatmul.mubr.msk.f32.vlgmr.msra.gmra.mrb[2].mxu1 %vm77_vm1, %v341_v13 }
 0x3c1   :  { %v426_v15 = vpop.f32.mrb[2].mxu1 }
 0x3c2   :  { %v427_v16 = vadd.f32 %v454_v14, %v426_v15  ;;  %v567_v17 = vpop.f32.mrb[3].mxu1 }
 0x3c4   :  { %431 = vst.msk [vmem:[#allocation7] sm:$0xff] %vm430_vm2, %v427_v16 }
 0x3c5   :  { %685 = shalt.err (!%p682_p6)
}
 0x3c6   :  { %s686_s0 = scalar_lea.hbm %s892_s9, 128 }
 0x3c7   :  { %p687_p7 = scmp.ne.s32.totalorder %s892_s9, %s686_s0  ;;  %p690_p8 = scmp.lt.u32.totalorder %s686_s0, %s892_s9 }
 0x3c9   :  { %p692_p9 = pnand %p690_p8, %p687_p7 }
 0x3cb   :  { %695 = shalt.err (!%p692_p9)
}
 0x3cc   :  { %441 = dma.vmem_to_hbm [thread:$0]  %s439_s27, 128, %s892_s9, [#allocation4]  }
 0x3cd   :  { %700 = dma.done.wait [#allocation4], 128  }
 0x3ce   :  { %701 = vsyncadd [#allocation4], 4294967168 }
 0x3cf   :  { %445 = vsyncpa [#allocation3], 1 }
 0x3d0   :  { %446 = vsyncpa [#allocation6], 1 }
 0x3d1   :  { %447 = vsyncpa [#allocation4], 1 }

</bundles_post_ra>
